<compile_context>
chip_gen: v7x
topology: tpu7x:2x2x1
jax: 0.10.0
libtpu: 0.0.40
codegen_flags: <defaults>
</compile_context>

<pallas_src>
import functools

import jax
import jax.numpy as jnp
from jax.experimental import pallas as pl
from jax.experimental.pallas import tpu as pltpu


def _head_kernel(*refs, n_inputs):
    # refs layout: x_0..x_{k-1}, w_0..w_{k-1}, bias, out
    #   x_i : (C_i, TM) bf16   w_i : (O, C_i) bf16   bias : (O, 1) f32
    #   out : (O, TM) f32
    xs = refs[:n_inputs]
    ws = refs[n_inputs:2 * n_inputs]
    b_ref = refs[2 * n_inputs]
    o_ref = refs[2 * n_inputs + 1]

    # Init the accumulator from the broadcast bias, then accumulate the
    # per-input MXU dots in f32 (single expression; no separate final add).
    acc = b_ref[...] + jnp.dot(ws[0][...], xs[0][...],
                               preferred_element_type=jnp.float32)
    for i in range(1, n_inputs):
        acc = acc + jnp.dot(ws[i][...], xs[i][...],
                            preferred_element_type=jnp.float32)
    o_ref[...] = acc.astype(o_ref.dtype)


def _vmem_budget_bytes():
    """~3/4 of physical VMEM (48 MiB on v7x, 96 MiB on v5e/v6e)."""
    cap = 64 * 1024 * 1024  # conservative fallback = v7x physical VMEM
    try:
        info = pltpu.get_tpu_info()
        cap = int(getattr(info, "vmem_capacity_bytes", cap))
    except Exception:
        pass
    return (cap * 3) // 4


def _pick_tile(hw, sum_c, out_c, x_bytes, out_bytes, budget, n_batch):
    """Largest legal lane tile that fits the double-buffered VMEM budget.

    Prefers tiles that evenly divide hw (no masked tail block) and guarantees
    >= 2 M blocks when batch < 2 so both v7x TensorCores are fed.
    """
    if hw <= 128:
        return hw  # full extent is always a legal block shape

    # Per-lane-column bytes of the double-buffered pipeline (activations + out).
    per_col = 2 * (x_bytes * sum_c + out_bytes * out_c)
    # Resident (constant index_map) weights + bias; small, but subtract anyway.
    resident = x_bytes * out_c * sum_c + 4 * out_c
    avail = max(budget - 2 * resident, 128 * per_col)
    budget_tile = max(128, (avail // per_col) // 128 * 128)

    max_tile = min(budget_tile, hw)

    if n_batch < 2 and max_tile >= hw:
        # Grid would degenerate to a single step: split M so v7x's two
        # TensorCores both get work (v5e/v6e single-TC: harmless).
        capped = ((hw - 1) // 128) * 128  # largest 128-multiple < hw
        max_tile = max(128, min(max_tile, capped))

    # Prefer the largest 128-multiple divisor of hw that fits (no masked tail).
    d = (max_tile // 128) * 128
    while d >= 128:
        if hw % d == 0:
            return d
        d -= 128

    # No even divisor: full extent if it fits, else 128-multiple + masked tail.
    if hw <= max_tile:
        return hw
    return (max_tile // 128) * 128


def head_pallas(xs, ws, bias, *, out_dtype=jnp.float32):
    """xs[i]: (N, C_i, HW) bf16, ws[i]: (O, C_i) bf16, bias: (O, 1) f32 -> (N, O, HW)."""
    k = len(xs)
    N, _, HW = xs[0].shape
    O = ws[0].shape[0]
    sum_c = sum(int(x.shape[1]) for x in xs)
    x_bytes = jnp.dtype(xs[0].dtype).itemsize
    out_bytes = jnp.dtype(out_dtype).itemsize

    budget = _vmem_budget_bytes()
    tile = _pick_tile(HW, sum_c, O, x_bytes, out_bytes, budget, N)
    n_m_blocks = pl.cdiv(HW, tile)

    x_specs = [
        pl.BlockSpec((None, x.shape[1], tile), lambda n, m: (n, 0, m))
        for x in xs
    ]
    # Weights / bias: constant index_map -> resident in VMEM across the grid.
    w_specs = [pl.BlockSpec(w.shape, lambda n, m: (0, 0)) for w in ws]
    b_spec = pl.BlockSpec(bias.shape, lambda n, m: (0, 0))
    out_spec = pl.BlockSpec((None, O, tile), lambda n, m: (n, 0, m))

    kernel = functools.partial(_head_kernel, n_inputs=k)

    return pl.pallas_call(
        kernel,
        out_shape=jax.ShapeDtypeStruct((N, O, HW), out_dtype),
        grid_spec=pltpu.PrefetchScalarGridSpec(
            num_scalar_prefetch=0,
            grid=(N, n_m_blocks),
            in_specs=x_specs + w_specs + [b_spec],
            out_specs=out_spec,
        ),
        compiler_params=pltpu.CompilerParams(
            dimension_semantics=("parallel", "parallel"),
            vmem_limit_bytes=budget,
        ),
    )(*xs, *ws, bias)


class HeadSpecPallas:
    """Concrete head: sum_i Conv1x1(x_i; in_channels[i] -> out_channels) + bias."""

    def __init__(self, in_channels, out_channels, in_strides=None, key=None):
        self.in_channels = list(in_channels)
        self.in_strides = in_strides
        self.out_channels = out_channels

        key = jax.random.PRNGKey(0) if key is None else key
        keys = jax.random.split(key, len(self.in_channels) + 1)
        # Per-input 1x1 conv weights (PyTorch (O, C_i, 1, 1)) stored as (O, C_i),
        # kept in bf16 (kernel is HBM-bound; MXU accumulates in f32).
        self.weights = []
        for wk, c_in in zip(keys[:-1], self.in_channels):
            w = jax.random.normal(wk, (out_channels, c_in), dtype=jnp.float32)
            w = w * (1.0 / jnp.sqrt(float(c_in)))
            self.weights.append(w.astype(jnp.bfloat16))
        self.bias = (
            jax.random.normal(keys[-1], (out_channels, 1), dtype=jnp.float32) * 0.01
        )

    def __call__(self, xs):
        # xs: list of NCHW arrays, all with the same (N, H, W).
        assert len(xs) == len(self.in_channels)
        N, _, H, W = xs[0].shape
        HW = H * W
        # Channel-major: NCHW -> (N, C_i, H*W) is a pure reshape (no transpose,
        # no concat, no extra HBM round-trip); cast to bf16 to halve HBM reads.
        xs_flat = [
            x.reshape(N, x.shape[1], HW).astype(jnp.bfloat16) for x in xs
        ]

        y = head_pallas(xs_flat, self.weights, self.bias)  # (N, O, HW) f32
        return y.reshape(N, self.out_channels, H, W)        # already NCHW


def _reference(xs, head):
    """Pure-JAX reference with the same bf16-quantized inputs / f32 accumulate."""
    N, _, H, W = xs[0].shape
    HW = H * W
    acc = jnp.zeros((N, head.out_channels, HW), jnp.float32)
    for x, w in zip(xs, head.weights):
        xb = x.reshape(N, x.shape[1], HW).astype(jnp.bfloat16).astype(jnp.float32)
        acc = acc + jnp.einsum("oc,ncm->nom", w.astype(jnp.float32), xb)
    acc = acc + head.bias[None, :, :]
    return acc.reshape(N, head.out_channels, H, W)


if __name__ == "__main__":
    key = jax.random.PRNGKey(0)
    k1, k2, kp = jax.random.split(key, 3)

    # Small shapes: batch=2, two feature maps with 4 and 8 channels, spatial 16x16.
    in_channels = [4, 8]
    out_channels = 3
    x0 = jax.random.normal(k1, (2, in_channels[0], 16, 16), dtype=jnp.float32)
    x1 = jax.random.normal(k2, (2, in_channels[1], 16, 16), dtype=jnp.float32)

    head = HeadSpecPallas(in_channels, out_channels, key=kp)

    out = head([x0, x1])
    out = jax.block_until_ready(out)

    ref = _reference([x0, x1], head)
    assert out.shape == (2, out_channels, 16, 16)
    assert jnp.allclose(out, ref, atol=1e-4, rtol=1e-4)

    print("KERNEL_OK")
</pallas_src>

<mosaic_0001>
module attributes {stable_mosaic.version = 11 : i64} {
  func.func @_head_kernel(%arg0: i32, %arg1: i32, %arg2: memref<1x4x256xbf16, #tpu.memory_space<vmem>>, %arg3: memref<1x8x256xbf16, #tpu.memory_space<vmem>>, %arg4: memref<3x4xbf16, #tpu.memory_space<vmem>>, %arg5: memref<3x8xbf16, #tpu.memory_space<vmem>>, %arg6: memref<3x1xf32, #tpu.memory_space<vmem>>, %arg7: memref<1x3x256xf32, #tpu.memory_space<vmem>>) attributes {dimension_semantics = [#tpu.dimension_semantics<parallel>, #tpu.dimension_semantics<parallel>], iteration_bounds = array<i64: 2, 1>, scalar_prefetch = 0 : i64, scratch_operands = 0 : i64, tpu.core_type = #tpu.core_type<tc>, window_params = [{transform_indices = @transform_0, window_bounds = array<i64: 1, 4, 256>}, {transform_indices = @transform_1, window_bounds = array<i64: 1, 8, 256>}, {pipeline_mode = #tpu.pipeline_mode<synchronous>, transform_indices = @transform_2, window_bounds = array<i64: 3, 4>}, {pipeline_mode = #tpu.pipeline_mode<synchronous>, transform_indices = @transform_3, window_bounds = array<i64: 3, 8>}, {pipeline_mode = #tpu.pipeline_mode<synchronous>, transform_indices = @transform_4, window_bounds = array<i64: 3, 1>}, {transform_indices = @transform_5, window_bounds = array<i64: 1, 3, 256>}]} {
    %c0 = arith.constant 0 : index
    %c0_0 = arith.constant 0 : index
    %0 = vector.load %arg6[%c0, %c0_0] : memref<3x1xf32, #tpu.memory_space<vmem>>, vector<3x1xf32>
    %c0_1 = arith.constant 0 : index
    %c0_2 = arith.constant 0 : index
    %1 = vector.load %arg4[%c0_1, %c0_2] : memref<3x4xbf16, #tpu.memory_space<vmem>>, vector<3x4xbf16>
    %c0_3 = arith.constant 0 : index
    %c0_4 = arith.constant 0 : index
    %c0_5 = arith.constant 0 : index
    %2 = vector.load %arg2[%c0_3, %c0_4, %c0_5] : memref<1x4x256xbf16, #tpu.memory_space<vmem>>, vector<1x4x256xbf16>
    %3 = vector.shape_cast %2 : vector<1x4x256xbf16> to vector<4x256xbf16>
    %cst = arith.constant dense<0.000000e+00> : vector<3x256xf32>
    %4 = tpu.matmul %1, %3, %cst {dimension_numbers = #tpu.dot_dimension_numbers<[1], [0], [0], [1], [0, 0, 1, 1], [], []>} : vector<3x4xbf16>, vector<4x256xbf16>, vector<3x256xf32> -> vector<3x256xf32>
    %5 = vector.broadcast %0 : vector<3x1xf32> to vector<3x256xf32>
    %6 = arith.addf %5, %4 : vector<3x256xf32>
    %c0_6 = arith.constant 0 : index
    %c0_7 = arith.constant 0 : index
    %7 = vector.load %arg5[%c0_6, %c0_7] : memref<3x8xbf16, #tpu.memory_space<vmem>>, vector<3x8xbf16>
    %c0_8 = arith.constant 0 : index
    %c0_9 = arith.constant 0 : index
    %c0_10 = arith.constant 0 : index
    %8 = vector.load %arg3[%c0_8, %c0_9, %c0_10] : memref<1x8x256xbf16, #tpu.memory_space<vmem>>, vector<1x8x256xbf16>
    %9 = vector.shape_cast %8 : vector<1x8x256xbf16> to vector<8x256xbf16>
    %cst_11 = arith.constant dense<0.000000e+00> : vector<3x256xf32>
    %10 = tpu.matmul %7, %9, %cst_11 {dimension_numbers = #tpu.dot_dimension_numbers<[1], [0], [0], [1], [0, 0, 1, 1], [], []>} : vector<3x8xbf16>, vector<8x256xbf16>, vector<3x256xf32> -> vector<3x256xf32>
    %11 = arith.addf %6, %10 : vector<3x256xf32>
    %c0_12 = arith.constant 0 : index
    %c0_13 = arith.constant 0 : index
    %c0_14 = arith.constant 0 : index
    %12 = vector.load %arg7[%c0_12, %c0_13, %c0_14] : memref<1x3x256xf32, #tpu.memory_space<vmem>>, vector<1x3x256xf32>
    %13 = vector.shape_cast %12 : vector<1x3x256xf32> to vector<3x256xf32>
    %14 = vector.shape_cast %11 : vector<3x256xf32> to vector<1x3x256xf32>
    tpu.vector_store %arg7[%c0_12, %c0_13, %c0_14], %14 {strides = array<i32>} : memref<1x3x256xf32, #tpu.memory_space<vmem>>, vector<1x3x256xf32>,
    return
  }
  func.func @transform_0(%arg0: i32, %arg1: i32) -> (i32, i32, i32) {
    %c0_i32 = arith.constant 0 : i32
    %c0_i32_0 = arith.constant 0 : i32
    return %arg0, %c0_i32, %arg1 : i32, i32, i32
  }
  func.func @transform_1(%arg0: i32, %arg1: i32) -> (i32, i32, i32) {
    %c0_i32 = arith.constant 0 : i32
    %c0_i32_0 = arith.constant 0 : i32
    return %arg0, %c0_i32, %arg1 : i32, i32, i32
  }
  func.func @transform_2(%arg0: i32, %arg1: i32) -> (i32, i32) {
    %c0_i32 = arith.constant 0 : i32
    %c0_i32_0 = arith.constant 0 : i32
    %c0_i32_1 = arith.constant 0 : i32
    return %c0_i32, %c0_i32_0 : i32, i32
  }
  func.func @transform_3(%arg0: i32, %arg1: i32) -> (i32, i32) {
    %c0_i32 = arith.constant 0 : i32
    %c0_i32_0 = arith.constant 0 : i32
    %c0_i32_1 = arith.constant 0 : i32
    return %c0_i32, %c0_i32_0 : i32, i32
  }
  func.func @transform_4(%arg0: i32, %arg1: i32) -> (i32, i32) {
    %c0_i32 = arith.constant 0 : i32
    %c0_i32_0 = arith.constant 0 : i32
    %c0_i32_1 = arith.constant 0 : i32
    return %c0_i32, %c0_i32_0 : i32, i32
  }
  func.func @transform_5(%arg0: i32, %arg1: i32) -> (i32, i32, i32) {
    %c0_i32 = arith.constant 0 : i32
    %c0_i32_0 = arith.constant 0 : i32
    return %arg0, %c0_i32, %arg1 : i32, i32, i32
  }
}

</mosaic_0001>

<bundles_post_ra>
// kernel: tpu_custom_call.1
= control target key start
LH: loop header
LB: loop body
LE: loop exit
PB: predicated region body
PF: predicated region fallthrough
CT: control target
= control target key end

     0   :  { %10 = vsyncpa [#allocation3], 0  ;;  %s992_s0 = inlined_call_operand.hbm [shape: bf16[2,4,256], index: 0, kind: input, shape index: {}]   ;;  %s993_s1 = inlined_call_operand.hbm [shape: bf16[2,8,256], index: 1, kind: input, shape index: {}]   ;;  %s994_s2 = inlined_call_operand.vmem [shape: bf16[3,4], index: 2, kind: input, shape index: {}]   ;;  %s995_s3 = inlined_call_operand.vmem [shape: bf16[3,8], index: 3, kind: input, shape index: {}]   ;;  %s996_s4 = inlined_call_operand.vmem [shape: f32[3,1], index: 4, kind: input, shape index: {}]   ;;  %s997_s5 = inlined_call_operand.vmem [shape: f32[2,3,256], index: 5, kind: output, shape index: {}]  }
   0x1   :  { %12 = vsyncpa [#allocation3 + $0x1], 0 }
   0x2   :  { %13 = vsyncpa [#allocation5], 0 }
   0x3   :  { %15 = vsyncpa [#allocation5 + $0x1], 0  ;;  %s817_s18 = smov 0   ;;  %s819_s19 = smov 0  }
   0x4   :  { %s821_s20 = smov 0   ;;  %s823_s21 = smov 0  }
   0x5   :  { %s825_s22 = smov 0   ;;  %s827_s23 = smov 0  }
   0x6 LB: > { %s573_s24 = sadd.s32 4294967295, %s782_s23   ;;  %s33_s25 = sadd.s32 1, %s778_s22  ;;  %s782_s23 = sphi %s827_s23, %s21_s23   ;;  %s778_s22 = sphi %s825_s22, %s1011_s22   ;;  %s774_s21 = sphi %s823_s21, %s1010_s21   ;;  %s770_s20 = sphi %s821_s20, %s1009_s20   ;;  %s766_s19 = sphi %s819_s19, %s1008_s19   ;;  %s762_s18 = sphi %s817_s18, %s1007_s18  }
   0x7   : > { %p35_p0 = scmp.ge.s32.totalorder %s33_s25, 2  ;;  %s42_s26 = sadd.s32 1, %s770_s20 }
   0x8   : > { %p49_p1 = scmp.ne.s32.totalorder %s770_s20, %s766_s19  ;;  %p50_p2 = scmp.eq.s32.totalorder %s782_s23, 0 }
   0x9   : > { %s1013_s25 = smov (%p35_p0, %s33_s25), 0  ;;  %p55_p4 = scmp.ne.s32.totalorder %s766_s19, %s762_s18 }
   0xa   : > { %p853_p3 = por %p50_p2, %p49_p1  ;;  %s37_s28 = ssub.s32 %s778_s22, %s1013_s25 }
   0xb   : > { %p56_p5 = scmp.eq.s32.totalorder %s573_s24, 0  ;;  %p40_p6 = scmp.eq.s32.totalorder %s37_s28, 0 }
   0xc   : > { %p615_p8 = scmp.lt.s32.totalorder %s782_s23, 2  ;;  %s869_s6 = sand.u32 1, %s770_s20  }
   0xd   : > { %p860_p7 = por %p56_p5, %p55_p4  ;;  %s597_s7 = sshll.u32 %s778_s22, 6 }
   0xe   : > { %s866_s30 = scalar_select %p40_p6, %s770_s20, %s42_s26  }
   0xf   : > { %s1000_s29 = scalar_select %p860_p7, 1, 0 }
  0x10   : > { %s577_s8 = sshll.u32 %s869_s6, 2  ;;  %s876_s11 = scalar_lea.hbm %s992_s0, %s597_s7 }
  0x11   : > { %s211_s12 = scalar_lea.vmem [#allocation2], %s577_s8  ;;  %p880_p9 = pnand %p615_p8, %p853_p3 }
  0x12   : > { %s221_s13 = sshll.u32 %s211_s12, 4  ;;  %s208_s15 = scalar_lea.sflag [#allocation3], %s869_s6  ;;  %s884_s13 = int_to_ptr.vmem [resolvable:$true] %s221_s13 }
  0x13   : > { %s668_s16 = scalar_lea.hbm %s876_s11, 64  ;;  %p670_p13 = pneg %p880_p9 }
  0x14   : > { %p669_p12 = scmp.ne.s32.totalorder %s876_s11, %s668_s16  ;;  %s673_s24 = scalar_lea.hbm %s992_s0, 128 }
  0x15   : > { %p674_p2 = scmp.lt.u32.totalorder %s876_s11, %s992_s0  ;;  %p675_p3 = scmp.lt.u32.totalorder %s673_s24, %s668_s16 }
  0x16   : > { %p671_p0 = pnand %p670_p13, %p669_p12  ;;  %p677_p5 = scmp.lt.u32.totalorder %s668_s16, %s876_s11 }
  0x17   : > { %p676_p4 = por %p675_p3, %p674_p2 }
  0x18   : > { %p672_p1 = pneg %p671_p0 }
  0x19   : > { %p678_p6 = por %p677_p5, %p676_p4 }
  0x1b   : > { %p679_p8 = pnand %p678_p6, %p672_p1 }
  0x1d   : > { %682 = shalt.err (!%p679_p8)
}
  0x1e   : > { %s683_s28 = scalar_lea.vmem %s884_s13, 64  ;;  %s784_s7 = smov [#allocation2]  }
  0x1f   : > { %p684_p12 = scmp.ne.s32.totalorder %s884_s13, %s683_s28  ;;  %s688_s8 = sshll.u32 %s784_s7, 4  ;;  %s689_s8 = int_to_ptr.vmem [resolvable:$false] %s688_s8 }
  0x20   : > { %s690_s9 = scalar_lea.vmem %s689_s8, 128  ;;  %p691_p11 = scmp.lt.s32.totalorder %s884_s13, %s689_s8 }
  0x21   : > { %p686_p0 = pnand %p684_p12, %p670_p13  ;;  %p692_p2 = scmp.lt.s32.totalorder %s690_s9, %s683_s28 }
  0x23   : > { %p687_p10 = pneg %p686_p0  ;;  %p693_p3 = por %p692_p2, %p691_p11 }
  0x25   : > { %p694_p4 = pnand %p693_p3, %p687_p10 }
  0x27   : > { %697 = shalt.err (!%p694_p4)
}
  0x28   : > { %611 = dma.hbm_to_vmem [thread:$0]  (!%p880_p9), %s876_s11, 64, %s884_s13, %s208_s15  }
  0x29   : > { %p1002_p1 = scmp.lt.s32.totalorder %s782_s23, 3  ;;  %p1003_p5 = scmp.ge.s32.totalorder %s782_s23, 1 }
  0x2a   : > { %s580_s12 = sshll.u32 %s869_s6, 3  ;;  %s598_s16 = sshll.u32 %s778_s22, 7 }
  0x2b   : > { %p918_p6 = pnand %p1003_p5, %p1002_p1  ;;  %s927_s24 = scalar_lea.hbm %s993_s1, %s598_s16 }
  0x2c   : > { %s232_s26 = scalar_lea.vmem [#allocation4], %s580_s12  ;;  %s229_s11 = scalar_lea.sflag [#allocation5], %s869_s6 }
  0x2d   : > { %s1004_s10 = scalar_select %p918_p6, 1, 0 }
  0x2e   : > { %s242_s27 = sshll.u32 %s232_s26, 4  ;;  %s698_s13 = scalar_lea.hbm %s927_s24, 128  ;;  %s243_s27 = int_to_ptr.vmem [resolvable:$true] %s242_s27 }
  0x2f   : > { %p699_p10 = scmp.ne.s32.totalorder %s927_s24, %s698_s13  ;;  %s703_s7 = scalar_lea.hbm %s993_s1, 256 }
  0x30   : > { %p704_p12 = scmp.lt.u32.totalorder %s927_s24, %s993_s1  ;;  %p705_p0 = scmp.lt.u32.totalorder %s703_s7, %s698_s13 }
  0x31   : > { %p701_p11 = pnand %p699_p10, %p670_p13  ;;  %p707_p3 = scmp.lt.u32.totalorder %s698_s13, %s927_s24 }
  0x32   : > { %p706_p2 = por %p705_p0, %p704_p12 }
  0x33   : > { %p702_p8 = pneg %p701_p11 }
  0x34   : > { %p708_p4 = por %p707_p3, %p706_p2 }
  0x36   : > { %p709_p1 = pnand %p708_p4, %p702_p8 }
  0x38   : > { %712 = shalt.err (!%p709_p1)
}
  0x39   : > { %s713_s6 = scalar_lea.vmem %s243_s27, 128  ;;  %s785_s12 = smov [#allocation4]  }
  0x3a   : > { %p714_p5 = scmp.ne.s32.totalorder %s243_s27, %s713_s6  ;;  %s718_s16 = sshll.u32 %s785_s12, 4  ;;  %s719_s16 = int_to_ptr.vmem [resolvable:$false] %s718_s16 }
  0x3b   : > { %s720_s17 = scalar_lea.vmem %s719_s16, 256  ;;  %p721_p7 = scmp.lt.s32.totalorder %s243_s27, %s719_s16 }
  0x3c   : > { %p716_p10 = pnand %p714_p5, %p670_p13  ;;  %p722_p6 = scmp.lt.s32.totalorder %s720_s17, %s713_s6 }
  0x3e   : > { %p717_p11 = pneg %p716_p10  ;;  %p723_p0 = por %p722_p6, %p721_p7 }
  0x40   : > { %p724_p12 = pnand %p723_p0, %p717_p11 }
  0x42   : > { %727 = shalt.err (!%p724_p12)
}
  0x43   : > { %614 = dma.hbm_to_vmem [thread:$0]  (!%p880_p9), %s927_s24, 128, %s243_s27, %s229_s11  }
  0x44   : > { %p1005_p8 = scmp.ne.s32.totalorder %s1004_s10, 0 }
  0x45   : > { %s253_s18 = sand.u32 (!%p1005_p8), 1, %s766_s19   ;;  %p1006_p13 = scmp.ne.s32.totalorder (!%p1005_p8), %s1000_s29, 0 }
  0x46   : > { %251 = sbr.rel (%p1005_p8) target bundleno = 309 (0x135), region = 40  ;;  %s584_s26 = sshll.u32 (!%p1005_p8), %s253_s18, 2 }
  0x47   : > { %s254_s13 = scalar_lea.sflag (!%p1005_p8), [#allocation3], %s253_s18  ;;  %s257_s15 = scalar_lea.vmem (!%p1005_p8), [#allocation2], %s584_s26 }
  0x4d   : > { %753 = dma.done.wait (%p1006_p13), %s254_s13, 64  }
  0x4e   : > { %755 = vsyncadd (%p1006_p13), %s254_s13, 4294967232  ;;  %s585_s28 = sshll.u32 %s253_s18, 3  ;;  %s263_s7 = scalar_lea.sflag [#allocation5], %s253_s18 }
  0x4f   : > { %s266_s14 = scalar_lea.vmem [#allocation4], %s585_s28 }
  0x50   : > { %757 = dma.done.wait (%p1006_p13), %s263_s7, 128  }
  0x51   : > { %759 = vsyncadd (%p1006_p13), %s263_s7, 4294967168  ;;  %v786_v0 = vmov 0   ;;  %vm331_vm0 = vcmask 1041408   ;;  %v387_v2 = vld [vmem:[%s266_s14] sm:$0xff]  ;;  %vm397_vm1 = vcmask 1043456   ;;  %vm327_vm2 = vcmask 31744  }
  0x52   : > { %370 = vmatprep.mubr.bf16.mxu1 %v786_v0  ;;  %436 = vmatprep.mubr.bf16.mxu0 %v786_v0  ;;  %v588_v1 = vld.sshfl [vmem:[%s257_s15] sm:$0x33 pattern:$0x76325410]  ;;  %v592_v4 = vcombine.high %v387_v2, %v387_v2  ;;  %v591_v6 = vcombine.low %v387_v2, %v387_v2  ;;  %vm393_vm3 = vcmask 64512   ;;  %p305_p7 = scmp.lt.s32.totalorder %s774_s21, 1 }
  0x53   : > { %665 = vset.pattern.permute.xlu0 %v786_v0  ;;  %v326_v3 = vcombine.high %v588_v1, %v588_v1  ;;  %v333_v5 = vsel %vm331_vm0, %v588_v1, 0  ;;  %v315_v7 = vld [vmem:[%s996_s4] sm:$0x7] }
  0x54   : > { %593 = vmatprep.subr.msk.bf16.mxu0 %vm397_vm1, %v592_v4  ;;  %v399_v8 = vsel %vm397_vm1, %v591_v6, 0  ;;  %v316_v9 = vld [vmem:[%s994_s2] sm:$0x3]  ;;  %381 = vperm.xlu0 %665, %v315_v7   ;;  %s1015_s21 = smov (!%p305_p7, %s774_s21), 1 }
  0x55   : > { %589 = vmatprep.subr.msk.bf16.mxu1 %vm331_vm0, %v326_v3  ;;  %405 = vmatpush1.bf16.msra.mxu0 %v399_v8  ;;  %v386_v10 = vld [vmem:[%s995_s3] sm:$0x3]  ;;  %s599_s9 = sshll.u32 %s1015_s21, 3 }
  0x56   : > { %339 = vmatpush1.bf16.msra.mxu1 %v333_v5  ;;  %s312_s16 = scalar_lea.vmem %s997_s5, %s599_s9 }
  0x58   : > { %594 = vmatmul.mubr.msk.bf16.vlgmr.msra.gmra.mrb[0].mxu0 %vm393_vm3, %v386_v10 }
  0x59   : > { %590 = vmatmul.mubr.msk.bf16.vlgmr.msra.gmra.mrb[0].mxu1 %vm327_vm2, %v316_v9 }
  0xd3   : > { %v382_v11 = vpop.permute.xlu0 %381 }
 0x12b   : > { %v438_v13 = vpop.f32.mrb[0].mxu0 }
 0x12c   : > { %v372_v12 = vpop.f32.mrb[0].mxu1  ;;  %v440_v16 = vpop.f32.mrb[1].mxu0 }
 0x12d   : > { %v384_v14 = vadd.f32 %v382_v11, %v372_v12  ;;  %v374_v15 = vpop.f32.mrb[1].mxu1  ;;  %v442_v19 = vpop.f32.mrb[2].mxu0 }
 0x12e   : > { %v385_v17 = vadd.f32 %v382_v11, %v374_v15  ;;  %v376_v18 = vpop.f32.mrb[2].mxu1  ;;  %v443_v22 = vpop.f32.mrb[3].mxu0 }
 0x12f   : > { %v445_v20 = vadd.f32 %v438_v13, %v384_v14  ;;  %v377_v21 = vpop.f32.mrb[3].mxu1 }
 0x130   : > { %v446_v23 = vadd.f32 %v440_v16, %v385_v17 }
 0x132   : > { %v449_v24 = vcombine.low %v445_v20, %v446_v23 }
 0x134   : > { %451 = vst [vmem:[%s312_s16] sm:$0x77] %v449_v24 }
 0x135 PF: > { %s21_s23 = sadd.s32 1, %s782_s23   ;;  %s1007_s18 = smov %s766_s19 }
 0x136   : > { %p18_p9 = scmp.ge.s32.totalorder %s21_s23, 4   ;;  %s1008_s19 = smov %s770_s20 }
 0x137   : > { %s1009_s20 = smov %s866_s30  ;;  %s1010_s21 = smov %s778_s22 }
 0x138   : > { %s1011_s22 = smov %s1013_s25  ;;  %20 = sbr.rel (!%p18_p9) target bundleno = 6 (0x6), region = 93 }
 0x13f   :  { %482 = vsyncpa [#allocation3], 1 }
 0x140   :  { %484 = vsyncpa [#allocation3 + $0x1], 1 }
 0x141   :  { %485 = vsyncpa [#allocation5], 1 }
 0x142   :  { %487 = vsyncpa [#allocation5 + $0x1], 1 }

</bundles_post_ra>
